<compile_context>
chip_gen: v7x
topology: tpu7x:2x2x1
jax: 0.10.0
libtpu: 0.0.40
codegen_flags: <defaults>
</compile_context>

<pallas_src>
import functools

import jax
import jax.numpy as jnp
from jax.experimental import pallas as pl
from jax.experimental.pallas import tpu as pltpu


def _contrastive_head_kernel(pos_ref, neg_ref, out_ref, m_scr, l_scr, *,
                             temperature, k_cols, tile_k):
    ki = pl.program_id(1)            # column-block index (reduction, innermost)
    nk = pl.num_programs(1)

    inv_t = 1.0 / temperature

    # Start of each row block: fold the positive logit (implicit column 0)
    # into the online-LSE state:  m = pos/T,  l = exp(pos/T - m) = 1.
    @pl.when(ki == 0)
    def _init_row_state():
        m_scr[...] = pos_ref[...].astype(jnp.float32) * inv_t
        l_scr[...] = jnp.ones_like(l_scr)

    def online_update(s):
        # Numerically stable flash-style log-sum-exp carry.
        m_prev = m_scr[...]
        l_prev = l_scr[...]
        m_new = jnp.maximum(m_prev, jnp.max(s, axis=-1, keepdims=True))
        l_scr[...] = (l_prev * jnp.exp(m_prev - m_new)
                      + jnp.sum(jnp.exp(s - m_new), axis=-1, keepdims=True))
        m_scr[...] = m_new

    # Hot path: a single VPU multiply per element.
    s = neg_ref[...].astype(jnp.float32) * inv_t          # (tile_n, tile_k)

    if k_cols % tile_k == 0:
        # No tail: never pay any masking cost.
        online_update(s)
    else:
        @pl.when(ki < nk - 1)
        def _bulk_blocks():
            online_update(s)

        @pl.when(ki == nk - 1)
        def _tail_block():
            tile_n = s.shape[0]
            col = ki * tile_k + jax.lax.broadcasted_iota(
                jnp.int32, (tile_n, tile_k), 1)
            online_update(jnp.where(col < k_cols, s, -jnp.inf))

    # After the last K block: finish the per-row cross-entropy
    #   loss_i = logsumexp_j(logits_ij) - pos_i/T = m + log(l) - pos_i/T.
    @pl.when(ki == nk - 1)
    def _finalize_rows():
        pos_t = pos_ref[...].astype(jnp.float32) * inv_t
        out_ref[...] = m_scr[...] + jnp.log(l_scr[...]) - pos_t


def contrastive_head_loss(pos, neg, temperature=0.1):
    """Pallas implementation of ContrastiveHead.forward (return_accs=False)."""
    assert pos.ndim == 2 and pos.shape[1] == 1, "pos must be (N, 1)"
    assert neg.ndim == 2 and neg.shape[0] == pos.shape[0], "neg must be (N, K)"
    n, k = neg.shape

    # 256 x 4096 f32 block = 4 MiB (double-buffered = 8 MiB): fits every
    # generation once vmem_limit_bytes is raised past v5e's 16 MiB default.
    MAX_TILE_N = 256      # multiple of 8 (sublanes)
    MAX_TILE_K = 4096     # multiple of 128 (lanes)
    tile_n = n if n <= MAX_TILE_N else MAX_TILE_N
    tile_k = k if k <= MAX_TILE_K else MAX_TILE_K
    grid = (pl.cdiv(n, tile_n), pl.cdiv(k, tile_k))

    kernel = functools.partial(
        _contrastive_head_kernel,
        temperature=float(temperature), k_cols=k, tile_k=tile_k)

    itemsize = jnp.dtype(neg.dtype).itemsize
    cost = pl.CostEstimate(
        flops=4 * n * k,
        transcendentals=n * (k + 2),
        bytes_accessed=itemsize * n * (k + 1) + 4 * n)

    per_row = pl.pallas_call(
        kernel,
        out_shape=jax.ShapeDtypeStruct((n, 1), jnp.float32),
        grid_spec=pltpu.PrefetchScalarGridSpec(
            num_scalar_prefetch=0,
            grid=grid,
            in_specs=[
                # pos block is resident across the whole ki loop (one DMA / ni).
                pl.BlockSpec((tile_n, 1), lambda ni, ki: (ni, 0)),
                pl.BlockSpec((tile_n, tile_k), lambda ni, ki: (ni, ki)),
            ],
            # Per-row losses: block index depends only on ni -> the row axis
            # carries no cross-block state and can be megacore-sharded.
            out_specs=pl.BlockSpec((tile_n, 1), lambda ni, ki: (ni, 0)),
            scratch_shapes=[
                pltpu.VMEM((tile_n, 1), jnp.float32),   # running max m
                pltpu.VMEM((tile_n, 1), jnp.float32),   # running sum l
            ]),
        compiler_params=pltpu.CompilerParams(
            dimension_semantics=("parallel", "arbitrary"),
            vmem_limit_bytes=40 << 20),
        cost_estimate=cost,
    )(pos, neg)

    # Tiny XLA reduce; matches CrossEntropyLoss(reduction='mean').
    return jnp.mean(per_row)


def _reference_loss(pos, neg, temperature=0.1):
    # Pure-JAX reference mirroring the PyTorch module exactly.
    logits = jnp.concatenate([pos, neg], axis=1).astype(jnp.float32) / temperature
    lse = jax.nn.logsumexp(logits, axis=1)
    return jnp.mean(lse - logits[:, 0])


if __name__ == "__main__":
    key = jax.random.PRNGKey(0)
    k_pos, k_neg, k_pos2, k_neg2 = jax.random.split(key, 4)

    # Small shapes consistent with the module: N samples, 1 positive sim,
    # K negative sims per sample (single-block path).
    N, K = 8, 16
    pos = jax.random.normal(k_pos, (N, 1), dtype=jnp.float32)
    neg = jax.random.normal(k_neg, (N, K), dtype=jnp.float32)

    loss = jax.block_until_ready(contrastive_head_loss(pos, neg, temperature=0.1))
    ref = jax.block_until_ready(_reference_loss(pos, neg, temperature=0.1))
    assert jnp.allclose(loss, ref, rtol=1e-5, atol=1e-5), (loss, ref)

    # Non-divisible N and K, grid > 1 on both axes: exercises the online-LSE
    # carry, the K-tail masked branch and the N-tail partial output block.
    N2, K2 = 1037, 4500
    pos2 = jax.random.normal(k_pos2, (N2, 1), dtype=jnp.float32)
    neg2 = jax.random.normal(k_neg2, (N2, K2), dtype=jnp.float32)
    loss2 = jax.block_until_ready(contrastive_head_loss(pos2, neg2, temperature=0.1))
    ref2 = jax.block_until_ready(_reference_loss(pos2, neg2, temperature=0.1))
    assert jnp.allclose(loss2, ref2, rtol=1e-4, atol=1e-4), (loss2, ref2)

    # bf16 caller contract (inputs upcast in-kernel; halves HBM traffic).
    pos3 = pos2.astype(jnp.bfloat16)
    neg3 = neg2.astype(jnp.bfloat16)
    loss3 = jax.block_until_ready(contrastive_head_loss(pos3, neg3, temperature=0.1))
    ref3 = jax.block_until_ready(_reference_loss(pos3, neg3, temperature=0.1))
    assert jnp.allclose(loss3, ref3, rtol=1e-4, atol=1e-4), (loss3, ref3)

    # TODO(synk): return_accs=True branch (top-1/top-5 accuracy) needs a top-k,
    # which is left to the host/XLA side rather than this Pallas kernel.
    print("KERNEL_OK")
</pallas_src>

<mosaic_0001>
module attributes {stable_mosaic.version = 11 : i64} {
  func.func @_contrastive_head_kernel(%arg0: i32, %arg1: i32, %arg2: memref<8x1xf32, #tpu.memory_space<vmem>>, %arg3: memref<8x16xf32, #tpu.memory_space<vmem>>, %arg4: memref<8x1xf32, #tpu.memory_space<vmem>>, %arg5: memref<8x1xf32, #tpu.memory_space<vmem>>, %arg6: memref<8x1xf32, #tpu.memory_space<vmem>>) attributes {dimension_semantics = [#tpu.dimension_semantics<parallel>, #tpu.dimension_semantics<arbitrary>], iteration_bounds = array<i64: 1, 1>, scalar_prefetch = 0 : i64, scratch_operands = 2 : i64, tpu.core_type = #tpu.core_type<tc>, window_params = [{transform_indices = @transform_0, window_bounds = array<i64: 8, 1>}, {transform_indices = @transform_1, window_bounds = array<i64: 8, 16>}, {transform_indices = @transform_2, window_bounds = array<i64: 8, 1>}]} {
    %c0_i32 = arith.constant 0 : i32
    %0 = arith.cmpi eq, %arg1, %c0_i32 : i32
    %1 = arith.extui %0 : i1 to i32
    %c0_i32_0 = arith.constant 0 : i32
    %2 = arith.cmpi ne, %1, %c0_i32_0 : i32
    scf.if %2 {
      %c0_14 = arith.constant 0 : index
      %c0_15 = arith.constant 0 : index
      %25 = vector.load %arg2[%c0_14, %c0_15] : memref<8x1xf32, #tpu.memory_space<vmem>>, vector<8x1xf32>
      %cst_16 = arith.constant 1.000000e+01 : f32
      %26 = vector.broadcast %cst_16 : f32 to vector<8x1xf32>
      %27 = arith.mulf %25, %26 : vector<8x1xf32>
      %c0_17 = arith.constant 0 : index
      %c0_18 = arith.constant 0 : index
      %28 = vector.load %arg5[%c0_17, %c0_18] : memref<8x1xf32, #tpu.memory_space<vmem>>, vector<8x1xf32>
      tpu.vector_store %arg5[%c0_17, %c0_18], %27 {strides = array<i32>} : memref<8x1xf32, #tpu.memory_space<vmem>>, vector<8x1xf32>,
      %cst_19 = arith.constant 1.000000e+00 : f32
      %29 = vector.broadcast %cst_19 : f32 to vector<8x1xf32>
      %c0_20 = arith.constant 0 : index
      %c0_21 = arith.constant 0 : index
      %30 = vector.load %arg6[%c0_20, %c0_21] : memref<8x1xf32, #tpu.memory_space<vmem>>, vector<8x1xf32>
      tpu.vector_store %arg6[%c0_20, %c0_21], %29 {strides = array<i32>} : memref<8x1xf32, #tpu.memory_space<vmem>>, vector<8x1xf32>,
    } else {
    }
    %c0 = arith.constant 0 : index
    %c0_1 = arith.constant 0 : index
    %3 = vector.load %arg3[%c0, %c0_1] : memref<8x16xf32, #tpu.memory_space<vmem>>, vector<8x16xf32>
    %cst = arith.constant 1.000000e+01 : f32
    %4 = vector.broadcast %cst : f32 to vector<8x16xf32>
    %5 = arith.mulf %3, %4 : vector<8x16xf32>
    %c0_2 = arith.constant 0 : index
    %c0_3 = arith.constant 0 : index
    %6 = vector.load %arg5[%c0_2, %c0_3] : memref<8x1xf32, #tpu.memory_space<vmem>>, vector<8x1xf32>
    %c0_4 = arith.constant 0 : index
    %c0_5 = arith.constant 0 : index
    %7 = vector.load %arg6[%c0_4, %c0_5] : memref<8x1xf32, #tpu.memory_space<vmem>>, vector<8x1xf32>
    %cst_6 = arith.constant dense<0xFF800000> : vector<8xf32>
    %8 = vector.multi_reduction <maximumf>, %5, %cst_6 [1] : vector<8x16xf32> to vector<8xf32>
    %9 = vector.shape_cast %8 : vector<8xf32> to vector<8x1xf32>
    %10 = arith.maximumf %6, %9 : vector<8x1xf32>
    %11 = arith.subf %6, %10 : vector<8x1xf32>
    %12 = math.exp %11 : vector<8x1xf32>
    %13 = arith.mulf %7, %12 : vector<8x1xf32>
    %14 = vector.broadcast %10 : vector<8x1xf32> to vector<8x16xf32>
    %15 = arith.subf %5, %14 : vector<8x16xf32>
    %16 = math.exp %15 : vector<8x16xf32>
    %cst_7 = arith.constant dense<0.000000e+00> : vector<8xf32>
    %17 = vector.multi_reduction <add>, %16, %cst_7 [1] : vector<8x16xf32> to vector<8xf32>
    %18 = vector.shape_cast %17 : vector<8xf32> to vector<8x1xf32>
    %19 = arith.addf %13, %18 : vector<8x1xf32>
    %c0_8 = arith.constant 0 : index
    %c0_9 = arith.constant 0 : index
    %20 = vector.load %arg6[%c0_8, %c0_9] : memref<8x1xf32, #tpu.memory_space<vmem>>, vector<8x1xf32>
    tpu.vector_store %arg6[%c0_8, %c0_9], %19 {strides = array<i32>} : memref<8x1xf32, #tpu.memory_space<vmem>>, vector<8x1xf32>,
    %c0_10 = arith.constant 0 : index
    %c0_11 = arith.constant 0 : index
    %21 = vector.load %arg5[%c0_10, %c0_11] : memref<8x1xf32, #tpu.memory_space<vmem>>, vector<8x1xf32>
    tpu.vector_store %arg5[%c0_10, %c0_11], %10 {strides = array<i32>} : memref<8x1xf32, #tpu.memory_space<vmem>>, vector<8x1xf32>,
    %c0_i32_12 = arith.constant 0 : i32
    %22 = arith.cmpi eq, %arg1, %c0_i32_12 : i32
    %23 = arith.extui %22 : i1 to i32
    %c0_i32_13 = arith.constant 0 : i32
    %24 = arith.cmpi ne, %23, %c0_i32_13 : i32
    scf.if %24 {
      %c0_14 = arith.constant 0 : index
      %c0_15 = arith.constant 0 : index
      %25 = vector.load %arg2[%c0_14, %c0_15] : memref<8x1xf32, #tpu.memory_space<vmem>>, vector<8x1xf32>
      %cst_16 = arith.constant 1.000000e+01 : f32
      %26 = vector.broadcast %cst_16 : f32 to vector<8x1xf32>
      %27 = arith.mulf %25, %26 : vector<8x1xf32>
      %c0_17 = arith.constant 0 : index
      %c0_18 = arith.constant 0 : index
      %28 = vector.load %arg5[%c0_17, %c0_18] : memref<8x1xf32, #tpu.memory_space<vmem>>, vector<8x1xf32>
      %c0_19 = arith.constant 0 : index
      %c0_20 = arith.constant 0 : index
      %29 = vector.load %arg6[%c0_19, %c0_20] : memref<8x1xf32, #tpu.memory_space<vmem>>, vector<8x1xf32>
      %30 = math.log %29 : vector<8x1xf32>
      %31 = arith.addf %28, %30 : vector<8x1xf32>
      %32 = arith.subf %31, %27 : vector<8x1xf32>
      %c0_21 = arith.constant 0 : index
      %c0_22 = arith.constant 0 : index
      %33 = vector.load %arg4[%c0_21, %c0_22] : memref<8x1xf32, #tpu.memory_space<vmem>>, vector<8x1xf32>
      tpu.vector_store %arg4[%c0_21, %c0_22], %32 {strides = array<i32>} : memref<8x1xf32, #tpu.memory_space<vmem>>, vector<8x1xf32>,
    } else {
    }
    return
  }
  func.func @transform_0(%arg0: i32, %arg1: i32) -> (i32, i32) {
    %c0_i32 = arith.constant 0 : i32
    %c0_i32_0 = arith.constant 0 : i32
    return %arg0, %c0_i32 : i32, i32
  }
  func.func @transform_1(%arg0: i32, %arg1: i32) -> (i32, i32) {
    %c0_i32 = arith.constant 0 : i32
    return %arg0, %arg1 : i32, i32
  }
  func.func @transform_2(%arg0: i32, %arg1: i32) -> (i32, i32) {
    %c0_i32 = arith.constant 0 : i32
    %c0_i32_0 = arith.constant 0 : i32
    return %arg0, %c0_i32 : i32, i32
  }
}

</mosaic_0001>

<bundles_post_ra>
// kernel: tpu_custom_call.1
= control target key start
LH: loop header
LB: loop body
LE: loop exit
PB: predicated region body
PF: predicated region fallthrough
CT: control target
= control target key end

     0   :  { %vm24_vm0 = vcmask 130048   ;;  %vm17_vm1 = vcmask 7168   ;;  %v73_v5 = vmov 0   ;;  %v74_v6 = vmov 1.0   ;;  %s106_s1 = inlined_call_operand.vmem [shape: f32[8,16], index: 1, kind: input, shape index: {}]   ;;  %s107_s0 = inlined_call_operand.vmem [shape: f32[8,1], index: 0, kind: input, shape index: {}]   ;;  %s108_s2 = inlined_call_operand.vmem [shape: f32[8,1], index: 2, kind: output, shape index: {}]  }
   0x1   :  { %v20_v0 = vld [vmem:[%s106_s1] sm:$0xff]  ;;  %66 = vset.pattern.permute.xlu0 %v73_v5  ;;  %19 = vst.msk [vmem:[#allocation3] sm:$0xff] %vm17_vm1, %v74_v6 }
   0x2   :  { %v21_v1 = vmul.f32 10.0, %v20_v0  ;;  %v15_v3 = vld [vmem:[%s107_s0] sm:$0xff] }
   0x3   :  { %v16_v4 = vmul.f32 10.0, %v15_v3 }
   0x4   :  { %v25_v2 = vsel %vm24_vm0, %v21_v1, -inf }
   0x5   :  { %26 = vmax.xlane.f32.xlu0 %v25_v2  ;;  %18 = vst.msk [vmem:[#allocation2] sm:$0xff] %vm17_vm1, %v16_v4 }
   0x8   :  { %v23_v18 = vld [vmem:[#allocation3] sm:$0xff] }
   0xc   :  { %v22_v7 = vld [vmem:[#allocation2] sm:$0xff] }
  0x92   :  { %v27_v8 = vpop.xlane.xlu0 %26 }
  0x93   :  { %v28_v9 = vmax.f32 %v22_v7, %v27_v8 }
  0x95   :  { %v29_v10 = vsub.f32 %v22_v7, %v28_v9  ;;  %47 = vst.msk [vmem:[#allocation2] sm:$0xff] %vm17_vm1, %v28_v9  ;;  %35 = vperm.xlu0 %66, %v28_v9  }
  0x97   :  { %v30_v16 = vmul.f32 1.442695, %v29_v10 }
  0x9c   :  { %v53_v25 = vld [vmem:[#allocation2] sm:$0xff] }
 0x114   :  { %v36_v11 = vpop.permute.xlu0 %35 }
 0x115   :  { %v38_v12 = vsub.f32 %v21_v1, %v36_v11 }
 0x117   :  { %v39_v13 = vmul.f32 1.442695, %v38_v12 }
 0x119   :  { %67 = vpow2.f32 %v39_v13 }
 0x11a   :  { %69 = vpow2.f32 %v30_v16 }
 0x123   :  { %v68_v14 = vpop.eup %67 }
 0x124   :  { %v41_v15 = vsel %vm24_vm0, %v68_v14, 0.0  ;;  %v70_v17 = vpop.eup %69 }
 0x125   :  { %42 = vadd.xlane.f32.xlu1 %v41_v15  ;;  %v32_v19 = vmul.f32 %v70_v17, %v23_v18 }
 0x1b2   :  { %v43_v20 = vpop.xlane.xlu1 %42 }
 0x1b3   :  { %v44_v21 = vadd.f32 %v43_v20, %v32_v19 }
 0x1b5   :  { %46 = vst.msk [vmem:[#allocation3] sm:$0xff] %vm17_vm1, %v44_v21 }
 0x1bc   :  { %v54_v22 = vld [vmem:[#allocation3] sm:$0xff] }
 0x1bd   :  { %71 = vlog2.f32 %v54_v22 }
 0x1c7   :  { %v72_v23 = vpop.eup %71 }
 0x1c8   :  { %v56_v24 = vmul.f32 0.6931472, %v72_v23 }
 0x1ca   :  { %v57_v26 = vadd.f32 %v56_v24, %v53_v25 }
 0x1cc   :  { %v58_v27 = vsub.f32 %v57_v26, %v16_v4 }
 0x1ce   :  { %59 = vst.msk [vmem:[%s108_s2] sm:$0xff] %vm17_vm1, %v58_v27 }

</bundles_post_ra>
